<compile_context>
chip_gen: v5e
topology: v5e:2x2
jax: 0.10.0
libtpu: 0.0.40
codegen_flags: <defaults>
</compile_context>

<pallas_src>
import jax
import jax.numpy as jnp
from jax.experimental import pallas as pl
from jax.experimental.pallas import tpu as pltpu

# Hyperparameters implied by the module's __init__ (small, synthetic).
EMBEDDING_DIM = 32
HIDDEN_SIZE = 32
NUM_LANG = 4
OUTPUT_SIZE = 2
LSTM_DROPOUT = 0.5   # inference => identity
VOCAB_SIZE = 16
BATCH = 2
SEQ_LEN = 8
BATCH_PAD = 8        # f32 sublane tile
OUT_PAD = 128        # lane-dense padded output width: sent = cols [0:2], lang = cols [2:6]

# Merged constant-slab row layout (all sections 8-row aligned).
R_EMB = 0                                  # rows [ 0,16): embeddings @ W_ih + (b_ih+b_hh)
R_WHH = R_EMB + VOCAB_SIZE                 # rows [16,48): W_hh^T
R_WHEAD = R_WHH + HIDDEN_SIZE              # rows [48,80): fused head weight
R_BHEAD = R_WHEAD + HIDDEN_SIZE            # row   80    : fused head bias
SLAB_ROWS = ((R_BHEAD + 1 + 7) // 8) * 8   # 88


def _lstm_disc_kernel(tok_ref, len_ref, slab_ref, out_ref):
    """tok_ref : (T*Bp, 1)        i32, time-major flat tokens (row = t*Bp + b)
       len_ref : (Bp, 1)          i32, per-sequence lengths (0 for padded rows)
       slab_ref: (SLAB_ROWS, 128) f32, merged constant slab (layout above)
       out_ref : (Bp, OUT_PAD)    f32, lane-dense combined head output"""
    TB = tok_ref.shape[0]
    Bp = len_ref.shape[0]
    T = TB // Bp
    H = HIDDEN_SIZE
    V = VOCAB_SIZE

    # Constant sections of the merged slab (all tile-aligned static slices).
    emb_proj = slab_ref[R_EMB:R_EMB + V, :]            # (V, 4H)  embeddings@W_ih + bias
    w_hh = slab_ref[R_WHH:R_WHH + H, :]                # (H, 4H)
    w_head = slab_ref[R_WHEAD:R_WHEAD + H, :]          # (H, OUT_PAD)
    b_head = slab_ref[R_BHEAD:R_BHEAD + 1, :]          # (1, OUT_PAD)

    # Fused embedding lookup + input projection: one-hot(tokens) @ (emb @ W_ih + b).
    # Each one-hot row has exactly one 1, so the folded bias row is added once per row.
    tok = tok_ref[...]                                                    # (TB, 1) i32
    vocab_ids = jax.lax.broadcasted_iota(jnp.int32, (TB, V), 1)           # (TB, V)
    onehot = (tok == vocab_ids).astype(jnp.float32)                       # (TB, V)
    gx = jnp.dot(onehot, emb_proj, preferred_element_type=jnp.float32)    # (TB, 4H)

    # Hoisted pack_padded freeze masks: keep[t, b] = t < length[b].
    lens = len_ref[...]                                                   # (Bp, 1)
    step_ids = jax.lax.broadcasted_iota(jnp.int32, (T, Bp, 1), 0)
    keep = step_ids < lens                                                # (T, Bp, 1) bool

    h = jnp.zeros((Bp, H), jnp.float32)
    c = jnp.zeros((Bp, H), jnp.float32)

    # Fully unrolled recurrence (T small & static); h/c stay vreg-resident.
    # TODO(synk): on v5e/v6e, keeping W_hh resident in MXU weight registers via
    # pltpu.matmul_push_rhs / matmul_acc_lhs / matmul_pop would trim per-step MXU
    # staging from the serial chain; on v7x the MRB could fold the "+ gx_t" into
    # the result-read path. Kept as portable jnp.dot here.
    for t in range(T):
        gates = gx[t * Bp:(t + 1) * Bp, :] + jnp.dot(
            h, w_hh, preferred_element_type=jnp.float32)                  # (Bp, 4H) one tile
        # One sigmoid + one tanh over the full gate row, then lane-slice
        # (PyTorch gate order: i, f, g, o).
        # TODO(synk): verify via bundle dump that these 32-lane gate slices do not
        # emit per-step lane rotations against c (lanes 0:31); if they do, keep c/h
        # replicated across the four gate groups instead.
        sig = jax.nn.sigmoid(gates)
        tng = jnp.tanh(gates)
        i_g = sig[:, 0 * H:1 * H]
        f_g = sig[:, 1 * H:2 * H]
        g_g = tng[:, 2 * H:3 * H]
        o_g = sig[:, 3 * H:4 * H]
        c_new = f_g * c + i_g * g_g
        h_new = o_g * jnp.tanh(c_new)
        m = keep[t]                                                       # (Bp, 1) bool
        h = jnp.where(m, h_new, h)
        c = jnp.where(m, c_new, c)

    # Fused heads (LeakyReLU(True) => slope 1.0 => identity; dropout identity at
    # inference; grad_reverse identity in forward): one matmul, one unmasked
    # lane-dense (Bp, 128) store.
    out_ref[...] = (jnp.dot(h, w_head, preferred_element_type=jnp.float32)
                    + b_head)


def prepare_disc_params(p):
    """One-time constant preprocessing (runs once at init, NOT per call)."""
    H = HIDDEN_SIZE
    # Fold embedding table, input projection and LSTM bias into one slab section.
    emb_proj = p["embeddings"] @ p["w_ih"] + p["b_lstm"]        # (VOCAB, 4H)
    # Fold both identity-activation 2-layer heads into one lane-padded matmul.
    ws_f = p["ws1"] @ p["ws2"]                                  # (H, OUTPUT_SIZE)
    bs_f = p["bs1"] @ p["ws2"] + p["bs2"]                       # (1, OUTPUT_SIZE)
    wl_f = p["wl1"] @ p["wl2"]                                  # (H, NUM_LANG)
    bl_f = p["bl1"] @ p["wl2"] + p["bl2"]                       # (1, NUM_LANG)
    w_head = jnp.zeros((H, OUT_PAD), jnp.float32)
    w_head = w_head.at[:, :OUTPUT_SIZE].set(ws_f)
    w_head = w_head.at[:, OUTPUT_SIZE:OUTPUT_SIZE + NUM_LANG].set(wl_f)
    b_head = jnp.zeros((SLAB_ROWS - R_BHEAD, OUT_PAD), jnp.float32)       # 8-row padded block
    b_head = b_head.at[0, :OUTPUT_SIZE].set(bs_f[0])
    b_head = b_head.at[0, OUTPUT_SIZE:OUTPUT_SIZE + NUM_LANG].set(bl_f[0])
    slab = jnp.concatenate([emb_proj.astype(jnp.float32),
                            p["w_hh"].astype(jnp.float32),
                            w_head, b_head], axis=0)            # (88, 128)
    assert slab.shape == (SLAB_ROWS, 4 * H)
    return jax.device_put(slab)


@jax.jit
def lstm_word_disc_forward(x_tokens, x_lengths, slab):
    """x_tokens: (B, T) int32 (pad token 0 past each length),
       x_lengths: (B,) int32 (descending, >= 1), slab: prepare_disc_params output."""
    B, T = x_tokens.shape
    Bp = BATCH_PAD
    # Per-call work is only layout plumbing: pad batch to the f32 sublane tile and
    # flatten tokens time-major (row = t*Bp + b) so the kernel's input projection
    # covers all timesteps in one MXU op.
    tok_p = jnp.zeros((Bp, T), jnp.int32).at[:B, :].set(x_tokens.astype(jnp.int32))
    tok_tm = tok_p.T.reshape(T * Bp, 1)
    lens_p = jnp.zeros((Bp, 1), jnp.int32).at[:B, 0].set(x_lengths.astype(jnp.int32))

    vmem = pl.BlockSpec(memory_space=pltpu.MemorySpace.VMEM)
    out = pl.pallas_call(
        _lstm_disc_kernel,
        out_shape=jax.ShapeDtypeStruct((Bp, OUT_PAD), jnp.float32),
        in_specs=[vmem, vmem, vmem],
        out_specs=vmem,
        # Gridless single invocation: total footprint < 100 KB, far under VMEM on
        # all generations (v5e/v6e/v7x), so no tiling needed.
        # TODO(synk): if batch is ever scaled past ~8, add a batch grid axis with
        # dimension_semantics=("parallel",) so v7x's two TensorCores split the
        # sequences; the time recurrence must remain an in-kernel loop.
    )(tok_tm, lens_p, slab)

    sent = out[:B, :OUTPUT_SIZE]
    lang = out[:B, OUTPUT_SIZE:OUTPUT_SIZE + NUM_LANG]
    return sent, lang


def make_params(key):
    ks = jax.random.split(key, 12)
    scale = 0.1
    emb = scale * jax.random.normal(ks[0], (VOCAB_SIZE, EMBEDDING_DIM), jnp.float32)
    emb = emb.at[0].set(0.0)                                     # padding_idx=0
    H = HIDDEN_SIZE
    return {
        "embeddings": emb,
        # LSTM weights stored transposed vs PyTorch: (in, 4H) / (H, 4H).
        "w_ih": scale * jax.random.normal(ks[1], (EMBEDDING_DIM, 4 * H), jnp.float32),
        "w_hh": scale * jax.random.normal(ks[2], (H, 4 * H), jnp.float32),
        "b_lstm": scale * jax.random.normal(ks[3], (1, 4 * H), jnp.float32),  # b_ih + b_hh
        "ws1": scale * jax.random.normal(ks[4], (H, H), jnp.float32),
        "bs1": scale * jax.random.normal(ks[5], (1, H), jnp.float32),
        "ws2": scale * jax.random.normal(ks[6], (H, OUTPUT_SIZE), jnp.float32),
        "bs2": scale * jax.random.normal(ks[7], (1, OUTPUT_SIZE), jnp.float32),
        "wl1": scale * jax.random.normal(ks[8], (H, H), jnp.float32),
        "bl1": scale * jax.random.normal(ks[9], (1, H), jnp.float32),
        "wl2": scale * jax.random.normal(ks[10], (H, NUM_LANG), jnp.float32),
        "bl2": scale * jax.random.normal(ks[11], (1, NUM_LANG), jnp.float32),
    }


def reference_forward(x_tokens, x_lengths, p):
    """Pure-JAX reference (unfolded heads, explicit gather) for validation."""
    B, T = x_tokens.shape
    H = HIDDEN_SIZE
    emb = p["embeddings"][x_tokens]                  # (B, T, E)
    h = jnp.zeros((B, H), jnp.float32)
    c = jnp.zeros((B, H), jnp.float32)
    for t in range(T):
        x_t = emb[:, t, :]
        gates = x_t @ p["w_ih"] + h @ p["w_hh"] + p["b_lstm"]
        i_g = jax.nn.sigmoid(gates[:, 0 * H:1 * H])
        f_g = jax.nn.sigmoid(gates[:, 1 * H:2 * H])
        g_g = jnp.tanh(gates[:, 2 * H:3 * H])
        o_g = jax.nn.sigmoid(gates[:, 3 * H:4 * H])
        c_new = f_g * c + i_g * g_g
        h_new = o_g * jnp.tanh(c_new)
        m = (t < x_lengths)[:, None]
        h = jnp.where(m, h_new, h)
        c = jnp.where(m, c_new, c)
    # nn.LeakyReLU(True): negative_slope = float(True) = 1.0 (identity).
    leaky = lambda x: jnp.where(x >= 0, x, 1.0 * x)
    sent = leaky(h @ p["ws1"] + p["bs1"]) @ p["ws2"] + p["bs2"]
    lang = leaky(h @ p["wl1"] + p["bl1"]) @ p["wl2"] + p["bl2"]
    return sent, lang


if __name__ == "__main__":
    key = jax.random.PRNGKey(0)
    k_param, k_tok = jax.random.split(key)
    params = make_params(k_param)
    slab = prepare_disc_params(params)   # one-time constant preprocessing

    x_tokens = jax.random.randint(k_tok, (BATCH, SEQ_LEN), 1, VOCAB_SIZE, dtype=jnp.int32)
    # pack_padded_sequence requires descending, non-zero lengths; pad token 0 after length.
    x_lengths = jnp.array([SEQ_LEN, 5], dtype=jnp.int32)
    time_idx = jnp.arange(SEQ_LEN)[None, :]
    x_tokens = jnp.where(time_idx < x_lengths[:, None], x_tokens, 0)

    sent, lang = lstm_word_disc_forward(x_tokens, x_lengths, slab)
    jax.block_until_ready((sent, lang))

    sent_ref, lang_ref = reference_forward(x_tokens, x_lengths, params)
    assert sent.shape == (BATCH, OUTPUT_SIZE) and lang.shape == (BATCH, NUM_LANG)
    # Embedding/projection/head folding reassociates FP sums (~1e-7 differences).
    assert jnp.allclose(sent, sent_ref, atol=1e-4), "sentiment head mismatch"
    assert jnp.allclose(lang, lang_ref, atol=1e-4), "language head mismatch"

    # TODO(synk): nn.Dropout is active only in training mode; inference forward is identity.
    # TODO(synk): head folding is valid only while the activation is identity
    # (nn.LeakyReLU(True) sets negative_slope=1.0); if the intended module used
    # inplace=True with slope 0.01, unfold the heads and apply leaky-relu in-kernel.
    print("KERNEL_OK")
</pallas_src>

<mosaic_0001>
module attributes {stable_mosaic.version = 11 : i64} {
  func.func @_lstm_disc_kernel(%arg0: memref<64x1xi32, #tpu.memory_space<vmem>>, %arg1: memref<8x1xi32, #tpu.memory_space<vmem>>, %arg2: memref<88x128xf32, #tpu.memory_space<vmem>>, %arg3: memref<8x128xf32, #tpu.memory_space<vmem>>) attributes {dimension_semantics = [], scalar_prefetch = 0 : i64, scratch_operands = 0 : i64, tpu.core_type = #tpu.core_type<tc>} {
    %c0 = arith.constant 0 : index
    %c0_0 = arith.constant 0 : index
    %0 = vector.load %arg2[%c0, %c0_0] : memref<88x128xf32, #tpu.memory_space<vmem>>, vector<16x128xf32>
    %c16 = arith.constant 16 : index
    %c0_1 = arith.constant 0 : index
    %1 = vector.load %arg2[%c16, %c0_1] : memref<88x128xf32, #tpu.memory_space<vmem>>, vector<32x128xf32>
    %c48 = arith.constant 48 : index
    %c0_2 = arith.constant 0 : index
    %2 = vector.load %arg2[%c48, %c0_2] : memref<88x128xf32, #tpu.memory_space<vmem>>, vector<32x128xf32>
    %c80 = arith.constant 80 : index
    %c0_3 = arith.constant 0 : index
    %3 = vector.load %arg2[%c80, %c0_3] : memref<88x128xf32, #tpu.memory_space<vmem>>, vector<1x128xf32>
    %c0_4 = arith.constant 0 : index
    %c0_5 = arith.constant 0 : index
    %4 = vector.load %arg0[%c0_4, %c0_5] : memref<64x1xi32, #tpu.memory_space<vmem>>, vector<64x1xi32>
    %5 = tpu.iota {dimensions = array<i32: 1>} : vector<64x16xi32>
    %6 = vector.broadcast %4 : vector<64x1xi32> to vector<64x16xi32>
    %7 = arith.cmpi eq, %6, %5 : vector<64x16xi32>
    %8 = arith.extui %7 : vector<64x16xi1> to vector<64x16xi32>
    %9 = arith.sitofp %8 : vector<64x16xi32> to vector<64x16xf32>
    %cst = arith.constant dense<0.000000e+00> : vector<64x128xf32>
    %10 = tpu.matmul %9, %0, %cst {dimension_numbers = #tpu.dot_dimension_numbers<[1], [0], [0], [1], [0, 0, 1, 1], [], []>} : vector<64x16xf32>, vector<16x128xf32>, vector<64x128xf32> -> vector<64x128xf32>
    %c0_6 = arith.constant 0 : index
    %c0_7 = arith.constant 0 : index
    %11 = vector.load %arg1[%c0_6, %c0_7] : memref<8x1xi32, #tpu.memory_space<vmem>>, vector<8x1xi32>
    %12 = tpu.iota {dimensions = array<i32: 0>} : vector<8x8x1xi32>
    %13 = vector.shape_cast %11 : vector<8x1xi32> to vector<1x8x1xi32>
    %14 = vector.broadcast %13 : vector<1x8x1xi32> to vector<8x8x1xi32>
    %15 = arith.cmpi slt, %12, %14 : vector<8x8x1xi32>
    %cst_8 = arith.constant 0.000000e+00 : f32
    %16 = vector.broadcast %cst_8 : f32 to vector<8x32xf32>
    %cst_9 = arith.constant 0.000000e+00 : f32
    %17 = vector.broadcast %cst_9 : f32 to vector<8x32xf32>
    %18 = vector.extract_strided_slice %10 {offsets = [0, 0], sizes = [8, 128], strides = [1, 1]} : vector<64x128xf32> to vector<8x128xf32>
    %cst_10 = arith.constant dense<0.000000e+00> : vector<8x128xf32>
    %19 = tpu.matmul %16, %1, %cst_10 {dimension_numbers = #tpu.dot_dimension_numbers<[1], [0], [0], [1], [0, 0, 1, 1], [], []>} : vector<8x32xf32>, vector<32x128xf32>, vector<8x128xf32> -> vector<8x128xf32>
    %20 = arith.addf %18, %19 : vector<8x128xf32>
    %21 = arith.negf %20 : vector<8x128xf32>
    %22 = math.exp %21 : vector<8x128xf32>
    %cst_11 = arith.constant 1.000000e+00 : f32
    %23 = vector.broadcast %cst_11 : f32 to vector<8x128xf32>
    %24 = arith.addf %23, %22 : vector<8x128xf32>
    %25 = arith.divf %23, %24 : vector<8x128xf32>
    %26 = math.tanh %20 : vector<8x128xf32>
    %27 = vector.extract_strided_slice %25 {offsets = [0, 0], sizes = [8, 32], strides = [1, 1]} : vector<8x128xf32> to vector<8x32xf32>
    %28 = vector.extract_strided_slice %25 {offsets = [0, 32], sizes = [8, 32], strides = [1, 1]} : vector<8x128xf32> to vector<8x32xf32>
    %29 = vector.extract_strided_slice %26 {offsets = [0, 64], sizes = [8, 32], strides = [1, 1]} : vector<8x128xf32> to vector<8x32xf32>
    %30 = vector.extract_strided_slice %25 {offsets = [0, 96], sizes = [8, 32], strides = [1, 1]} : vector<8x128xf32> to vector<8x32xf32>
    %31 = arith.mulf %28, %17 : vector<8x32xf32>
    %32 = arith.mulf %27, %29 : vector<8x32xf32>
    %33 = arith.addf %31, %32 : vector<8x32xf32>
    %34 = math.tanh %33 : vector<8x32xf32>
    %35 = arith.mulf %30, %34 : vector<8x32xf32>
    %36 = vector.extract_strided_slice %15 {offsets = [0, 0, 0], sizes = [1, 8, 1], strides = [1, 1, 1]} : vector<8x8x1xi1> to vector<1x8x1xi1>
    %37 = vector.shape_cast %36 : vector<1x8x1xi1> to vector<8x1xi1>
    %38 = vector.shape_cast %37 : vector<8x1xi1> to vector<8x1xi1>
    %39 = vector.broadcast %38 : vector<8x1xi1> to vector<8x32xi1>
    %40 = arith.select %39, %35, %16 : vector<8x32xi1>, vector<8x32xf32>
    %41 = vector.shape_cast %37 : vector<8x1xi1> to vector<8x1xi1>
    %42 = vector.broadcast %41 : vector<8x1xi1> to vector<8x32xi1>
    %43 = arith.select %42, %33, %17 : vector<8x32xi1>, vector<8x32xf32>
    %44 = vector.extract_strided_slice %10 {offsets = [8, 0], sizes = [8, 128], strides = [1, 1]} : vector<64x128xf32> to vector<8x128xf32>
    %cst_12 = arith.constant dense<0.000000e+00> : vector<8x128xf32>
    %45 = tpu.matmul %40, %1, %cst_12 {dimension_numbers = #tpu.dot_dimension_numbers<[1], [0], [0], [1], [0, 0, 1, 1], [], []>} : vector<8x32xf32>, vector<32x128xf32>, vector<8x128xf32> -> vector<8x128xf32>
    %46 = arith.addf %44, %45 : vector<8x128xf32>
    %47 = arith.negf %46 : vector<8x128xf32>
    %48 = math.exp %47 : vector<8x128xf32>
    %cst_13 = arith.constant 1.000000e+00 : f32
    %49 = vector.broadcast %cst_13 : f32 to vector<8x128xf32>
    %50 = arith.addf %49, %48 : vector<8x128xf32>
    %51 = arith.divf %49, %50 : vector<8x128xf32>
    %52 = math.tanh %46 : vector<8x128xf32>
    %53 = vector.extract_strided_slice %51 {offsets = [0, 0], sizes = [8, 32], strides = [1, 1]} : vector<8x128xf32> to vector<8x32xf32>
    %54 = vector.extract_strided_slice %51 {offsets = [0, 32], sizes = [8, 32], strides = [1, 1]} : vector<8x128xf32> to vector<8x32xf32>
    %55 = vector.extract_strided_slice %52 {offsets = [0, 64], sizes = [8, 32], strides = [1, 1]} : vector<8x128xf32> to vector<8x32xf32>
    %56 = vector.extract_strided_slice %51 {offsets = [0, 96], sizes = [8, 32], strides = [1, 1]} : vector<8x128xf32> to vector<8x32xf32>
    %57 = arith.mulf %54, %43 : vector<8x32xf32>
    %58 = arith.mulf %53, %55 : vector<8x32xf32>
    %59 = arith.addf %57, %58 : vector<8x32xf32>
    %60 = math.tanh %59 : vector<8x32xf32>
    %61 = arith.mulf %56, %60 : vector<8x32xf32>
    %62 = vector.extract_strided_slice %15 {offsets = [1, 0, 0], sizes = [1, 8, 1], strides = [1, 1, 1]} : vector<8x8x1xi1> to vector<1x8x1xi1>
    %63 = vector.shape_cast %62 : vector<1x8x1xi1> to vector<8x1xi1>
    %64 = vector.shape_cast %63 : vector<8x1xi1> to vector<8x1xi1>
    %65 = vector.broadcast %64 : vector<8x1xi1> to vector<8x32xi1>
    %66 = arith.select %65, %61, %40 : vector<8x32xi1>, vector<8x32xf32>
    %67 = vector.shape_cast %63 : vector<8x1xi1> to vector<8x1xi1>
    %68 = vector.broadcast %67 : vector<8x1xi1> to vector<8x32xi1>
    %69 = arith.select %68, %59, %43 : vector<8x32xi1>, vector<8x32xf32>
    %70 = vector.extract_strided_slice %10 {offsets = [16, 0], sizes = [8, 128], strides = [1, 1]} : vector<64x128xf32> to vector<8x128xf32>
    %cst_14 = arith.constant dense<0.000000e+00> : vector<8x128xf32>
    %71 = tpu.matmul %66, %1, %cst_14 {dimension_numbers = #tpu.dot_dimension_numbers<[1], [0], [0], [1], [0, 0, 1, 1], [], []>} : vector<8x32xf32>, vector<32x128xf32>, vector<8x128xf32> -> vector<8x128xf32>
    %72 = arith.addf %70, %71 : vector<8x128xf32>
    %73 = arith.negf %72 : vector<8x128xf32>
    %74 = math.exp %73 : vector<8x128xf32>
    %cst_15 = arith.constant 1.000000e+00 : f32
    %75 = vector.broadcast %cst_15 : f32 to vector<8x128xf32>
    %76 = arith.addf %75, %74 : vector<8x128xf32>
    %77 = arith.divf %75, %76 : vector<8x128xf32>
    %78 = math.tanh %72 : vector<8x128xf32>
    %79 = vector.extract_strided_slice %77 {offsets = [0, 0], sizes = [8, 32], strides = [1, 1]} : vector<8x128xf32> to vector<8x32xf32>
    %80 = vector.extract_strided_slice %77 {offsets = [0, 32], sizes = [8, 32], strides = [1, 1]} : vector<8x128xf32> to vector<8x32xf32>
    %81 = vector.extract_strided_slice %78 {offsets = [0, 64], sizes = [8, 32], strides = [1, 1]} : vector<8x128xf32> to vector<8x32xf32>
    %82 = vector.extract_strided_slice %77 {offsets = [0, 96], sizes = [8, 32], strides = [1, 1]} : vector<8x128xf32> to vector<8x32xf32>
    %83 = arith.mulf %80, %69 : vector<8x32xf32>
    %84 = arith.mulf %79, %81 : vector<8x32xf32>
    %85 = arith.addf %83, %84 : vector<8x32xf32>
    %86 = math.tanh %85 : vector<8x32xf32>
    %87 = arith.mulf %82, %86 : vector<8x32xf32>
    %88 = vector.extract_strided_slice %15 {offsets = [2, 0, 0], sizes = [1, 8, 1], strides = [1, 1, 1]} : vector<8x8x1xi1> to vector<1x8x1xi1>
    %89 = vector.shape_cast %88 : vector<1x8x1xi1> to vector<8x1xi1>
    %90 = vector.shape_cast %89 : vector<8x1xi1> to vector<8x1xi1>
    %91 = vector.broadcast %90 : vector<8x1xi1> to vector<8x32xi1>
    %92 = arith.select %91, %87, %66 : vector<8x32xi1>, vector<8x32xf32>
    %93 = vector.shape_cast %89 : vector<8x1xi1> to vector<8x1xi1>
    %94 = vector.broadcast %93 : vector<8x1xi1> to vector<8x32xi1>
    %95 = arith.select %94, %85, %69 : vector<8x32xi1>, vector<8x32xf32>
    %96 = vector.extract_strided_slice %10 {offsets = [24, 0], sizes = [8, 128], strides = [1, 1]} : vector<64x128xf32> to vector<8x128xf32>
    %cst_16 = arith.constant dense<0.000000e+00> : vector<8x128xf32>
    %97 = tpu.matmul %92, %1, %cst_16 {dimension_numbers = #tpu.dot_dimension_numbers<[1], [0], [0], [1], [0, 0, 1, 1], [], []>} : vector<8x32xf32>, vector<32x128xf32>, vector<8x128xf32> -> vector<8x128xf32>
    %98 = arith.addf %96, %97 : vector<8x128xf32>
    %99 = arith.negf %98 : vector<8x128xf32>
    %100 = math.exp %99 : vector<8x128xf32>
    %cst_17 = arith.constant 1.000000e+00 : f32
    %101 = vector.broadcast %cst_17 : f32 to vector<8x128xf32>
    %102 = arith.addf %101, %100 : vector<8x128xf32>
    %103 = arith.divf %101, %102 : vector<8x128xf32>
    %104 = math.tanh %98 : vector<8x128xf32>
    %105 = vector.extract_strided_slice %103 {offsets = [0, 0], sizes = [8, 32], strides = [1, 1]} : vector<8x128xf32> to vector<8x32xf32>
    %106 = vector.extract_strided_slice %103 {offsets = [0, 32], sizes = [8, 32], strides = [1, 1]} : vector<8x128xf32> to vector<8x32xf32>
    %107 = vector.extract_strided_slice %104 {offsets = [0, 64], sizes = [8, 32], strides = [1, 1]} : vector<8x128xf32> to vector<8x32xf32>
    %108 = vector.extract_strided_slice %103 {offsets = [0, 96], sizes = [8, 32], strides = [1, 1]} : vector<8x128xf32> to vector<8x32xf32>
    %109 = arith.mulf %106, %95 : vector<8x32xf32>
    %110 = arith.mulf %105, %107 : vector<8x32xf32>
    %111 = arith.addf %109, %110 : vector<8x32xf32>
    %112 = math.tanh %111 : vector<8x32xf32>
    %113 = arith.mulf %108, %112 : vector<8x32xf32>
    %114 = vector.extract_strided_slice %15 {offsets = [3, 0, 0], sizes = [1, 8, 1], strides = [1, 1, 1]} : vector<8x8x1xi1> to vector<1x8x1xi1>
    %115 = vector.shape_cast %114 : vector<1x8x1xi1> to vector<8x1xi1>
    %116 = vector.shape_cast %115 : vector<8x1xi1> to vector<8x1xi1>
    %117 = vector.broadcast %116 : vector<8x1xi1> to vector<8x32xi1>
    %118 = arith.select %117, %113, %92 : vector<8x32xi1>, vector<8x32xf32>
    %119 = vector.shape_cast %115 : vector<8x1xi1> to vector<8x1xi1>
    %120 = vector.broadcast %119 : vector<8x1xi1> to vector<8x32xi1>
    %121 = arith.select %120, %111, %95 : vector<8x32xi1>, vector<8x32xf32>
    %122 = vector.extract_strided_slice %10 {offsets = [32, 0], sizes = [8, 128], strides = [1, 1]} : vector<64x128xf32> to vector<8x128xf32>
    %cst_18 = arith.constant dense<0.000000e+00> : vector<8x128xf32>
    %123 = tpu.matmul %118, %1, %cst_18 {dimension_numbers = #tpu.dot_dimension_numbers<[1], [0], [0], [1], [0, 0, 1, 1], [], []>} : vector<8x32xf32>, vector<32x128xf32>, vector<8x128xf32> -> vector<8x128xf32>
    %124 = arith.addf %122, %123 : vector<8x128xf32>
    %125 = arith.negf %124 : vector<8x128xf32>
    %126 = math.exp %125 : vector<8x128xf32>
    %cst_19 = arith.constant 1.000000e+00 : f32
    %127 = vector.broadcast %cst_19 : f32 to vector<8x128xf32>
    %128 = arith.addf %127, %126 : vector<8x128xf32>
    %129 = arith.divf %127, %128 : vector<8x128xf32>
    %130 = math.tanh %124 : vector<8x128xf32>
    %131 = vector.extract_strided_slice %129 {offsets = [0, 0], sizes = [8, 32], strides = [1, 1]} : vector<8x128xf32> to vector<8x32xf32>
    %132 = vector.extract_strided_slice %129 {offsets = [0, 32], sizes = [8, 32], strides = [1, 1]} : vector<8x128xf32> to vector<8x32xf32>
    %133 = vector.extract_strided_slice %130 {offsets = [0, 64], sizes = [8, 32], strides = [1, 1]} : vector<8x128xf32> to vector<8x32xf32>
    %134 = vector.extract_strided_slice %129 {offsets = [0, 96], sizes = [8, 32], strides = [1, 1]} : vector<8x128xf32> to vector<8x32xf32>
    %135 = arith.mulf %132, %121 : vector<8x32xf32>
    %136 = arith.mulf %131, %133 : vector<8x32xf32>
    %137 = arith.addf %135, %136 : vector<8x32xf32>
    %138 = math.tanh %137 : vector<8x32xf32>
    %139 = arith.mulf %134, %138 : vector<8x32xf32>
    %140 = vector.extract_strided_slice %15 {offsets = [4, 0, 0], sizes = [1, 8, 1], strides = [1, 1, 1]} : vector<8x8x1xi1> to vector<1x8x1xi1>
    %141 = vector.shape_cast %140 : vector<1x8x1xi1> to vector<8x1xi1>
    %142 = vector.shape_cast %141 : vector<8x1xi1> to vector<8x1xi1>
    %143 = vector.broadcast %142 : vector<8x1xi1> to vector<8x32xi1>
    %144 = arith.select %143, %139, %118 : vector<8x32xi1>, vector<8x32xf32>
    %145 = vector.shape_cast %141 : vector<8x1xi1> to vector<8x1xi1>
    %146 = vector.broadcast %145 : vector<8x1xi1> to vector<8x32xi1>
    %147 = arith.select %146, %137, %121 : vector<8x32xi1>, vector<8x32xf32>
    %148 = vector.extract_strided_slice %10 {offsets = [40, 0], sizes = [8, 128], strides = [1, 1]} : vector<64x128xf32> to vector<8x128xf32>
    %cst_20 = arith.constant dense<0.000000e+00> : vector<8x128xf32>
    %149 = tpu.matmul %144, %1, %cst_20 {dimension_numbers = #tpu.dot_dimension_numbers<[1], [0], [0], [1], [0, 0, 1, 1], [], []>} : vector<8x32xf32>, vector<32x128xf32>, vector<8x128xf32> -> vector<8x128xf32>
    %150 = arith.addf %148, %149 : vector<8x128xf32>
    %151 = arith.negf %150 : vector<8x128xf32>
    %152 = math.exp %151 : vector<8x128xf32>
    %cst_21 = arith.constant 1.000000e+00 : f32
    %153 = vector.broadcast %cst_21 : f32 to vector<8x128xf32>
    %154 = arith.addf %153, %152 : vector<8x128xf32>
    %155 = arith.divf %153, %154 : vector<8x128xf32>
    %156 = math.tanh %150 : vector<8x128xf32>
    %157 = vector.extract_strided_slice %155 {offsets = [0, 0], sizes = [8, 32], strides = [1, 1]} : vector<8x128xf32> to vector<8x32xf32>
    %158 = vector.extract_strided_slice %155 {offsets = [0, 32], sizes = [8, 32], strides = [1, 1]} : vector<8x128xf32> to vector<8x32xf32>
    %159 = vector.extract_strided_slice %156 {offsets = [0, 64], sizes = [8, 32], strides = [1, 1]} : vector<8x128xf32> to vector<8x32xf32>
    %160 = vector.extract_strided_slice %155 {offsets = [0, 96], sizes = [8, 32], strides = [1, 1]} : vector<8x128xf32> to vector<8x32xf32>
    %161 = arith.mulf %158, %147 : vector<8x32xf32>
    %162 = arith.mulf %157, %159 : vector<8x32xf32>
    %163 = arith.addf %161, %162 : vector<8x32xf32>
    %164 = math.tanh %163 : vector<8x32xf32>
    %165 = arith.mulf %160, %164 : vector<8x32xf32>
    %166 = vector.extract_strided_slice %15 {offsets = [5, 0, 0], sizes = [1, 8, 1], strides = [1, 1, 1]} : vector<8x8x1xi1> to vector<1x8x1xi1>
    %167 = vector.shape_cast %166 : vector<1x8x1xi1> to vector<8x1xi1>
    %168 = vector.shape_cast %167 : vector<8x1xi1> to vector<8x1xi1>
    %169 = vector.broadcast %168 : vector<8x1xi1> to vector<8x32xi1>
    %170 = arith.select %169, %165, %144 : vector<8x32xi1>, vector<8x32xf32>
    %171 = vector.shape_cast %167 : vector<8x1xi1> to vector<8x1xi1>
    %172 = vector.broadcast %171 : vector<8x1xi1> to vector<8x32xi1>
    %173 = arith.select %172, %163, %147 : vector<8x32xi1>, vector<8x32xf32>
    %174 = vector.extract_strided_slice %10 {offsets = [48, 0], sizes = [8, 128], strides = [1, 1]} : vector<64x128xf32> to vector<8x128xf32>
    %cst_22 = arith.constant dense<0.000000e+00> : vector<8x128xf32>
    %175 = tpu.matmul %170, %1, %cst_22 {dimension_numbers = #tpu.dot_dimension_numbers<[1], [0], [0], [1], [0, 0, 1, 1], [], []>} : vector<8x32xf32>, vector<32x128xf32>, vector<8x128xf32> -> vector<8x128xf32>
    %176 = arith.addf %174, %175 : vector<8x128xf32>
    %177 = arith.negf %176 : vector<8x128xf32>
    %178 = math.exp %177 : vector<8x128xf32>
    %cst_23 = arith.constant 1.000000e+00 : f32
    %179 = vector.broadcast %cst_23 : f32 to vector<8x128xf32>
    %180 = arith.addf %179, %178 : vector<8x128xf32>
    %181 = arith.divf %179, %180 : vector<8x128xf32>
    %182 = math.tanh %176 : vector<8x128xf32>
    %183 = vector.extract_strided_slice %181 {offsets = [0, 0], sizes = [8, 32], strides = [1, 1]} : vector<8x128xf32> to vector<8x32xf32>
    %184 = vector.extract_strided_slice %181 {offsets = [0, 32], sizes = [8, 32], strides = [1, 1]} : vector<8x128xf32> to vector<8x32xf32>
    %185 = vector.extract_strided_slice %182 {offsets = [0, 64], sizes = [8, 32], strides = [1, 1]} : vector<8x128xf32> to vector<8x32xf32>
    %186 = vector.extract_strided_slice %181 {offsets = [0, 96], sizes = [8, 32], strides = [1, 1]} : vector<8x128xf32> to vector<8x32xf32>
    %187 = arith.mulf %184, %173 : vector<8x32xf32>
    %188 = arith.mulf %183, %185 : vector<8x32xf32>
    %189 = arith.addf %187, %188 : vector<8x32xf32>
    %190 = math.tanh %189 : vector<8x32xf32>
    %191 = arith.mulf %186, %190 : vector<8x32xf32>
    %192 = vector.extract_strided_slice %15 {offsets = [6, 0, 0], sizes = [1, 8, 1], strides = [1, 1, 1]} : vector<8x8x1xi1> to vector<1x8x1xi1>
    %193 = vector.shape_cast %192 : vector<1x8x1xi1> to vector<8x1xi1>
    %194 = vector.shape_cast %193 : vector<8x1xi1> to vector<8x1xi1>
    %195 = vector.broadcast %194 : vector<8x1xi1> to vector<8x32xi1>
    %196 = arith.select %195, %191, %170 : vector<8x32xi1>, vector<8x32xf32>
    %197 = vector.shape_cast %193 : vector<8x1xi1> to vector<8x1xi1>
    %198 = vector.broadcast %197 : vector<8x1xi1> to vector<8x32xi1>
    %199 = arith.select %198, %189, %173 : vector<8x32xi1>, vector<8x32xf32>
    %200 = vector.extract_strided_slice %10 {offsets = [56, 0], sizes = [8, 128], strides = [1, 1]} : vector<64x128xf32> to vector<8x128xf32>
    %cst_24 = arith.constant dense<0.000000e+00> : vector<8x128xf32>
    %201 = tpu.matmul %196, %1, %cst_24 {dimension_numbers = #tpu.dot_dimension_numbers<[1], [0], [0], [1], [0, 0, 1, 1], [], []>} : vector<8x32xf32>, vector<32x128xf32>, vector<8x128xf32> -> vector<8x128xf32>
    %202 = arith.addf %200, %201 : vector<8x128xf32>
    %203 = arith.negf %202 : vector<8x128xf32>
    %204 = math.exp %203 : vector<8x128xf32>
    %cst_25 = arith.constant 1.000000e+00 : f32
    %205 = vector.broadcast %cst_25 : f32 to vector<8x128xf32>
    %206 = arith.addf %205, %204 : vector<8x128xf32>
    %207 = arith.divf %205, %206 : vector<8x128xf32>
    %208 = math.tanh %202 : vector<8x128xf32>
    %209 = vector.extract_strided_slice %207 {offsets = [0, 0], sizes = [8, 32], strides = [1, 1]} : vector<8x128xf32> to vector<8x32xf32>
    %210 = vector.extract_strided_slice %207 {offsets = [0, 32], sizes = [8, 32], strides = [1, 1]} : vector<8x128xf32> to vector<8x32xf32>
    %211 = vector.extract_strided_slice %208 {offsets = [0, 64], sizes = [8, 32], strides = [1, 1]} : vector<8x128xf32> to vector<8x32xf32>
    %212 = vector.extract_strided_slice %207 {offsets = [0, 96], sizes = [8, 32], strides = [1, 1]} : vector<8x128xf32> to vector<8x32xf32>
    %213 = arith.mulf %210, %199 : vector<8x32xf32>
    %214 = arith.mulf %209, %211 : vector<8x32xf32>
    %215 = arith.addf %213, %214 : vector<8x32xf32>
    %216 = math.tanh %215 : vector<8x32xf32>
    %217 = arith.mulf %212, %216 : vector<8x32xf32>
    %218 = vector.extract_strided_slice %15 {offsets = [7, 0, 0], sizes = [1, 8, 1], strides = [1, 1, 1]} : vector<8x8x1xi1> to vector<1x8x1xi1>
    %219 = vector.shape_cast %218 : vector<1x8x1xi1> to vector<8x1xi1>
    %220 = vector.shape_cast %219 : vector<8x1xi1> to vector<8x1xi1>
    %221 = vector.broadcast %220 : vector<8x1xi1> to vector<8x32xi1>
    %222 = arith.select %221, %217, %196 : vector<8x32xi1>, vector<8x32xf32>
    %cst_26 = arith.constant dense<0.000000e+00> : vector<8x128xf32>
    %223 = tpu.matmul %222, %2, %cst_26 {dimension_numbers = #tpu.dot_dimension_numbers<[1], [0], [0], [1], [0, 0, 1, 1], [], []>} : vector<8x32xf32>, vector<32x128xf32>, vector<8x128xf32> -> vector<8x128xf32>
    %224 = vector.broadcast %3 : vector<1x128xf32> to vector<8x128xf32>
    %225 = arith.addf %223, %224 : vector<8x128xf32>
    %c0_27 = arith.constant 0 : index
    %c0_28 = arith.constant 0 : index
    %226 = vector.load %arg3[%c0_27, %c0_28] : memref<8x128xf32, #tpu.memory_space<vmem>>, vector<8x128xf32>
    tpu.vector_store %arg3[%c0_27, %c0_28], %225 {strides = array<i32>} : memref<8x128xf32, #tpu.memory_space<vmem>>, vector<8x128xf32>,
    return
  }
}

</mosaic_0001>

<bundles_post_ra>
// kernel: lstm_word_disc_forward.1
= control target key start
LH: loop header
LB: loop body
LE: loop exit
PB: predicated region body
PF: predicated region fallthrough
CT: control target
= control target key end

     0   :  { %v855_v0 = vmov 0   ;;  %v33_v11 = vlaneseq  ;;  %vm83_vm0 = vcmask 130048   ;;  %v856_v14 = vmov 0.0   ;;  %s857_s5 = smov 64   ;;  %s858_s6 = smov 32   ;;  %s1093_s0 = inlined_call_operand.vmem [shape: s32[64,1], index: 0, kind: input, shape index: {}]   ;;  %s1094_s2 = inlined_call_operand.vmem [shape: f32[88,128], index: 2, kind: input, shape index: {}]   ;;  %s1095_s1 = inlined_call_operand.vmem [shape: s32[8,1], index: 1, kind: input, shape index: {}]   ;;  %s1096_s3 = inlined_call_operand.vmem [shape: f32[8,128], index: 3, kind: output, shape index: {}]  }
   0x1   :  { %787 = vset.pattern.permute.xlu0 %v855_v0  ;;  %v30_v1 = vld [vmem:[%s1093_s0 + $0x28] sm:$0xff]  ;;  %788 = vset.pattern.permute.xlu2 %v855_v0  ;;  %v25_v3 = vld [vmem:[%s1093_s0] sm:$0xff]  ;;  %v31_v4 = vld [vmem:[%s1093_s0 + $0x30] sm:$0xff]  ;;  %vm158_vm12 = vcmask 261120  }
   0x2   :  { %51 = vperm.xlu0 %787, %v30_v1   ;;  %v15_v2 = vld [vmem:[%s1094_s2 + $0x8] sm:$0xff]  ;;  %789 = vset.pattern.permute.xlu1 %v855_v0  ;;  %v14_v6 = vld [vmem:[%s1094_s2] sm:$0xff]  ;;  %v915_v9 = vld [vmem:[%s1094_s2 + $0x18] sm:$0xff]  ;;  %v936_v12 = vand.u32 127, %v33_v11 }
   0x3   :  { %779 = vmatpush.msra.mxu1 %v15_v2  ;;  %122 = vmatpush.msra.mxu0 %v15_v2  ;;  %v26_v5 = vld [vmem:[%s1093_s0 + $0x8] sm:$0xff]  ;;  %v908_v8 = vld [vmem:[%s1094_s2 + $0x20] sm:$0xff]  ;;  %v926_v10 = vld [vmem:[%s1094_s2 + $0x10] sm:$0xff] }
   0x4   :  { %780 = vmatpush.msra.mxu2 %v15_v2  ;;  %v903_v7 = vld [vmem:[%s1094_s2 + $0x28] sm:$0xff]  ;;  %v32_v42 = vld [vmem:[%s1093_s0 + $0x38] sm:$0xff]  ;;  %v973_v47 = vld [vmem:[%s1095_s1] sm:$0xff] }
   0x5   :  { %781 = vmatpush.msra.mxu1 %v14_v6  ;;  %123 = vmatpush.msra.mxu0 %v14_v6  ;;  %vm150_vm9 = vcmp.gt.s32.totalorder %v973_v47, 0  ;;  %vm151_vm13 = vcmp.gt.s32.totalorder %v973_v47, 1 }
   0x6   :  { %782 = vmatpush.msra.mxu2 %v14_v6  ;;  %314 = vmatpush.msra.mxu3 %v903_v7  ;;  %v220_v48 = vsel %vm150_vm9, 1, %v855_v0  ;;  %v290_v62 = vsel %vm151_vm13, 1, %v855_v0  ;;  %vm153_vm13 = vcmp.gt.s32.totalorder %v973_v47, 3 }
   0x7   :  { %174 = vmatpush.msrb.mxu1 %v903_v7 }
   0x8   :  { %244 = vmatpush.msrb.mxu2 %v903_v7  ;;  %315 = vmatpush.msra.mxu3 %v908_v8 }
   0x9   :  { %175 = vmatpush.msrb.mxu1 %v908_v8 }
   0xa   :  { %36 = vperm.xlu0 %787, %v25_v3   ;;  %245 = vmatpush.msrb.mxu2 %v908_v8 }
   0xb   :  { %176 = vmatpush.msrb.mxu1 %v915_v9  ;;  %316 = vmatpush.msra.mxu3 %v915_v9 }
   0xc   :  { %246 = vmatpush.msrb.mxu2 %v915_v9 }
   0xd   :  { %177 = vmatpush.msrb.mxu1 %v926_v10  ;;  %317 = vmatpush.msra.mxu3 %v926_v10 }
   0xe   :  { %247 = vmatpush.msrb.mxu2 %v926_v10 }
   0xf   :  { %524 = vmatpush.msrb.mxu3 %v903_v7 }
  0x11   :  { %525 = vmatpush.msrb.mxu3 %v908_v8 }
  0x12   :  { %54 = vperm.xlu0 %787, %v31_v4  }
  0x13   :  { %526 = vmatpush.msrb.mxu3 %v915_v9 }
  0x15   :  { %527 = vmatpush.msrb.mxu3 %v926_v10 }
  0x1a   :  { %39 = vperm.xlu0 %787, %v26_v5  }
  0x74   :  { %v52_v13 = vpop.permute.xlu0 %51 }
  0x75   :  { %vm64_vm1 = vcmp.eq.s32.totalorder %v52_v13, %v936_v12 }
  0x76   :  { %v752_v15 = vsel %vm64_vm1, 1.0, %v856_v14 }
  0x77   :  { %760 = vmatmul.msk.f32.vlgmr.msra.gmra.mxu1 %vm83_vm0, %v752_v15 }
  0x78   :  { %384 = vmatpush.msra.mxu1 %v903_v7 }
  0x7a   :  { %385 = vmatpush.msra.mxu1 %v908_v8 }
  0x7c   :  { %v37_v16 = vpop.permute.xlu0 %36  ;;  %386 = vmatpush.msra.mxu1 %v915_v9 }
  0x7d   :  { %vm59_vm2 = vcmp.eq.s32.totalorder %v37_v16, %v936_v12 }
  0x7e   :  { %v747_v17 = vsel %vm59_vm2, 1.0, %v856_v14  ;;  %387 = vmatpush.msra.mxu1 %v926_v10 }
  0x7f   :  { %755 = vmatmul.msk.f32.vlgmr.msra.gmra.mxu0 %vm83_vm0, %v747_v17  ;;  %178 = vmatmul.f32.vlgmr.msrb.gmra.mxu1 %v856_v14 }
  0x80   :  { %594 = vmatpush.msrb.mxu1 %v903_v7 }
  0x82   :  { %595 = vmatpush.msrb.mxu1 %v908_v8 }
  0x84   :  { %v55_v18 = vpop.permute.xlu0 %54  ;;  %596 = vmatpush.msrb.mxu1 %v915_v9 }
  0x85   :  { %vm65_vm3 = vcmp.eq.s32.totalorder %v55_v18, %v936_v12 }
  0x86   :  { %v753_v19 = vsel %vm65_vm3, 1.0, %v856_v14  ;;  %597 = vmatpush.msrb.mxu1 %v926_v10 }
  0x87   :  { %761 = vmatmul.msk.f32.vlgmr.msra.gmra.mxu2 %vm83_vm0, %v753_v19 }
  0x88   :  { %454 = vmatpush.msra.mxu2 %v903_v7 }
  0x8a   :  { %455 = vmatpush.msra.mxu2 %v908_v8 }
  0x8c   :  { %v40_v20 = vpop.permute.xlu0 %39  ;;  %456 = vmatpush.msra.mxu2 %v915_v9 }
  0x8d   :  { %vm60_vm4 = vcmp.eq.s32.totalorder %v40_v20, %v936_v12 }
  0x8e   :  { %v748_v21 = vsel %vm60_vm4, 1.0, %v856_v14  ;;  %457 = vmatpush.msra.mxu2 %v926_v10 }
  0x8f   :  { %756 = vmatmul.msk.f32.gmra.mxu0 %vm83_vm0, %v748_v21 }
  0xf4   :  { %v963_v22 = vpop.f32.mrf.mxu1 }
  0xfc   :  { %v125_v23 = vpop.f32.mrf.mxu0  ;;  %v179_v24 = vpop.f32.mrf.mxu1 }
  0xfd   :  { %v182_v25 = vadd.f32 %v179_v24, %v125_v23  ;;  %v27_v23 = vld [vmem:[%s1093_s0 + $0x10] sm:$0xff] }
  0xff   :  { %791 = vtanh.f32 %v182_v25  ;;  %v763_v27 = vmul.f32 -1.442695, %v182_v25 }
 0x101   :  { %793 = vpow2.f32 %v763_v27 }
 0x105   :  { %v792_v26 = vpop.eup %791 }
 0x106   :  { %205 = vrot.lane.b32.xlu1 %v792_v26, %s857_s5 }
 0x107   :  { %v794_v28 = vpop.eup %793 }
 0x108   :  { %v186_v29 = vadd.f32 1.0, %v794_v28 }
 0x10a   :  { %795 = vrcp.f32 %v186_v29  ;;  %v198_v35 = vand.u32 2147483648, %v186_v29  ;;  %vm192_vm6 = vweird.f32 %v186_v29  ;;  %v196_v36 = vand.u32 2147483647, %v186_v29  ;;  %v988_v56 = vpop.f32.mrf.mxu2 }
 0x10c   :  { %v199_v38 = vor.u32 1.1754944e-38, %v198_v35  ;;  %vm197_vm8 = vcmp.eq.f32.partialorder %v196_v36, 8.507059e+37  ;;  %v128_v58 = vpop.f32.mrf.mxu0 }
 0x110   :  { %v796_v30 = vpop.eup %795 }
 0x111   :  { %v188_v31 = vmul.f32 %v796_v30, %v186_v29  ;;  %vm193_vm5 = vweird.f32 %v796_v30 }
 0x112   :  { %vm194_vm7 = vmor %vm192_vm6, %vm193_vm5  ;;  %vm152_vm5 = vcmp.gt.s32.totalorder %v973_v47, 2 }
 0x113   :  { %v189_v32 = vsub.f32 1.0, %v188_v31  ;;  %v360_v35 = vsel %vm152_vm5, 1, %v855_v0  ;;  %vm154_vm5 = vcmp.gt.s32.totalorder %v973_v47, 4 }
 0x115   :  { %v190_v33 = vmul.f32 %v796_v30, %v189_v32 }
 0x117   :  { %v191_v34 = vadd.f32 %v796_v30, %v190_v33 }
 0x119   :  { %v195_v37 = vsel %vm194_vm7, %v796_v30, %v191_v34 }
 0x11a   :  { %v200_v40 = vsel %vm197_vm8, %v199_v38, %v195_v37 }
 0x11b   :  { %v203_v43 = vmul.f32 0.0, %v200_v40 }
 0x178   :  { %v206_v39 = vpop.permute.xlu1 %205 }
 0x179   :  { %v208_v41 = vmul.f32 %v206_v39, %v200_v40 }
 0x17b   :  { %210 = vrot.lane.b32.xlu1 %v208_v41, %s858_s6 }
 0x183   :  { %57 = vperm.xlu1 %789, %v32_v42  }
 0x1ed   :  { %v211_v44 = vpop.permute.xlu1 %210 }
 0x1ee   :  { %v213_v45 = vadd.f32 %v211_v44, %v203_v43 }
 0x1f0   :  { %797 = vtanh.f32 %v213_v45 }
 0x1f5   :  { %v58_v50 = vpop.permute.xlu1 %57 }
 0x1f6   :  { %v798_v46 = vpop.eup %797  ;;  %vm66_vm10 = vcmp.eq.s32.totalorder %v58_v50, %v936_v12 }
 0x1f7   :  { %216 = vrot.lane.b32.xlu2 %v798_v46, %s857_s5  ;;  %v754_v51 = vsel %vm66_vm10, 1.0, %v856_v14 }
 0x1f8   :  { %762 = vmatmul.msk.f32.gmra.mxu2 %vm83_vm0, %v754_v51 }
 0x1ff   :  { %222 = vperm.xlu2 %788, %v220_v48  }
 0x251   :  { %v217_v49 = vpop.permute.xlu2 %216 }
 0x252   :  { %v219_v52 = vmul.f32 %v217_v49, %v200_v40 }
 0x259   :  { %v223_v53 = vpop.permute.xlu2 %222 }
 0x25a   :  { %vm224_vm11 = vcmp.eq.s32.totalorder %v223_v53, 1 }
 0x25b   :  { %v225_v54 = vsel %vm224_vm11, %v219_v52, 0.0  ;;  %v226_v17 = vsel %vm224_vm11, %v213_v45, 0.0  ;;  %v28_v52 = vld [vmem:[%s1093_s0 + $0x18] sm:$0xff] }
 0x25c   :  { %228 = vrot.lane.b32.xlu2 %v225_v54, %s858_s6 }
 0x27b   :  { %v990_v57 = vpop.f32.mrf.mxu2 }
 0x2b6   :  { %v229_v55 = vpop.permute.xlu2 %228 }
 0x2b7   :  { %764 = vmatmul.msk.f32.vlgmr.msrb.gmra.mxu2 %vm158_vm12, %v229_v55 }
 0x2b8   :  { %664 = vmatpush.msrb.mxu2 %v903_v7 }
 0x2ba   :  { %665 = vmatpush.msrb.mxu2 %v908_v8 }
 0x2bc   :  { %666 = vmatpush.msrb.mxu2 %v915_v9 }
 0x2be   :  { %667 = vmatpush.msrb.mxu2 %v926_v10 }
 0x33a   :  { %v249_v59 = vpop.f32.mrf.mxu2 }
 0x33b   :  { %v252_v60 = vadd.f32 %v249_v59, %v128_v58 }
 0x33d   :  { %799 = vtanh.f32 %v252_v60  ;;  %v765_v63 = vmul.f32 -1.442695, %v252_v60 }
 0x33f   :  { %801 = vpow2.f32 %v765_v63 }
 0x343   :  { %v800_v61 = vpop.eup %799 }
 0x344   :  { %275 = vrot.lane.b32.xlu1 %v800_v61, %s857_s5 }
 0x345   :  { %v802_v1 = vpop.eup %801 }
 0x346   :  { %v256_v2 = vadd.f32 1.0, %v802_v1 }
 0x348   :  { %803 = vrcp.f32 %v256_v2  ;;  %v268_v8 = vand.u32 2147483648, %v256_v2  ;;  %vm262_vm15 = vweird.f32 %v256_v2  ;;  %v266_v9 = vand.u32 2147483647, %v256_v2 }
 0x34a   :  { %v269_v11 = vor.u32 1.1754944e-38, %v268_v8  ;;  %vm267_vm2 = vcmp.eq.f32.partialorder %v266_v9, 8.507059e+37  ;;  %v430_v8 = vsel %vm153_vm13, 1, %v855_v0 }
 0x34c   :  { %292 = vperm.xlu1 %789, %v290_v62  }
 0x34e   :  { %v804_v3 = vpop.eup %803 }
 0x34f   :  { %v258_v4 = vmul.f32 %v804_v3, %v256_v2  ;;  %vm263_vm14 = vweird.f32 %v804_v3 }
 0x350   :  { %vm264_vm1 = vmor %vm262_vm15, %vm263_vm14 }
 0x351   :  { %v259_v5 = vsub.f32 1.0, %v258_v4 }
 0x353   :  { %v260_v6 = vmul.f32 %v804_v3, %v259_v5 }
 0x355   :  { %v261_v7 = vadd.f32 %v804_v3, %v260_v6 }
 0x357   :  { %v265_v10 = vsel %vm264_vm1, %v804_v3, %v261_v7 }
 0x358   :  { %v270_v15 = vsel %vm267_vm2, %v269_v11, %v265_v10 }
 0x359   :  { %v273_v18 = vmul.f32 %v270_v15, %v226_v17 }
 0x3b6   :  { %v276_v13 = vpop.permute.xlu1 %275 }
 0x3b7   :  { %v278_v16 = vmul.f32 %v276_v13, %v270_v15 }
 0x3b9   :  { %280 = vrot.lane.b32.xlu2 %v278_v16, %s858_s6 }
 0x3be   :  { %v293_v24 = vpop.permute.xlu1 %292 }
 0x3bf   :  { %vm294_vm3 = vcmp.eq.s32.totalorder %v293_v24, 1 }
 0x413   :  { %v281_v19 = vpop.permute.xlu2 %280 }
 0x414   :  { %v283_v20 = vadd.f32 %v281_v19, %v273_v18 }
 0x416   :  { %805 = vtanh.f32 %v283_v20  ;;  %v296_v53 = vsel %vm294_vm3, %v283_v20, %v226_v17 }
 0x41c   :  { %v806_v21 = vpop.eup %805 }
 0x41d   :  { %286 = vrot.lane.b32.xlu0 %v806_v21, %s857_s5 }
 0x425   :  { %42 = vperm.xlu0 %787, %v27_v23  }
 0x48f   :  { %v287_v25 = vpop.permute.xlu0 %286 }
 0x490   :  { %v289_v26 = vmul.f32 %v287_v25, %v270_v15 }
 0x492   :  { %v295_v27 = vsel %vm294_vm3, %v289_v26, %v225_v54 }
 0x493   :  { %298 = vrot.lane.b32.xlu2 %v295_v27, %s858_s6 }
 0x497   :  { %v43_v28 = vpop.permute.xlu0 %42 }
 0x498   :  { %vm61_vm4 = vcmp.eq.s32.totalorder %v43_v28, %v936_v12 }
 0x499   :  { %v749_v29 = vsel %vm61_vm4, 1.0, %v856_v14 }
 0x49a   :  { %757 = vmatmul.msk.f32.gmra.mxu0 %vm83_vm0, %v749_v29 }
 0x4ed   :  { %v299_v30 = vpop.permute.xlu2 %298 }
 0x4ee   :  { %766 = vmatmul.msk.f32.vlgmr.msra.gmra.mxu3 %vm158_vm12, %v299_v30 }
 0x517   :  { %v131_v31 = vpop.f32.mrf.mxu0 }
 0x571   :  { %v319_v32 = vpop.f32.mrf.mxu3 }
 0x572   :  { %v322_v33 = vadd.f32 %v319_v32, %v131_v31  ;;  %v29_v32 = vld [vmem:[%s1093_s0 + $0x20] sm:$0xff] }
 0x574   :  { %807 = vtanh.f32 %v322_v33  ;;  %v767_v36 = vmul.f32 -1.442695, %v322_v33 }
 0x576   :  { %809 = vpow2.f32 %v767_v36 }
 0x57a   :  { %v808_v34 = vpop.eup %807 }
 0x57b   :  { %345 = vrot.lane.b32.xlu1 %v808_v34, %s857_s5 }
 0x57c   :  { %v810_v37 = vpop.eup %809 }
 0x57d   :  { %v326_v38 = vadd.f32 1.0, %v810_v37 }
 0x57f   :  { %811 = vrcp.f32 %v326_v38  ;;  %v338_v44 = vand.u32 2147483648, %v326_v38  ;;  %vm332_vm7 = vweird.f32 %v326_v38  ;;  %v336_v45 = vand.u32 2147483647, %v326_v38 }
 0x581   :  { %v339_v48 = vor.u32 1.1754944e-38, %v338_v44  ;;  %vm337_vm9 = vcmp.eq.f32.partialorder %v336_v45, 8.507059e+37  ;;  %v500_v44 = vsel %vm154_vm5, 1, %v855_v0 }
 0x583   :  { %362 = vperm.xlu1 %789, %v360_v35  }
 0x585   :  { %v812_v39 = vpop.eup %811 }
 0x586   :  { %v328_v40 = vmul.f32 %v812_v39, %v326_v38  ;;  %vm333_vm6 = vweird.f32 %v812_v39 }
 0x587   :  { %vm334_vm8 = vmor %vm332_vm7, %vm333_vm6 }
 0x588   :  { %v329_v41 = vsub.f32 1.0, %v328_v40 }
 0x58a   :  { %v330_v42 = vmul.f32 %v812_v39, %v329_v41 }
 0x58c   :  { %v331_v43 = vadd.f32 %v812_v39, %v330_v42 }
 0x58e   :  { %v335_v46 = vsel %vm334_vm8, %v812_v39, %v331_v43 }
 0x58f   :  { %v340_v50 = vsel %vm337_vm9, %v339_v48, %v335_v46 }
 0x590   :  { %v343_v54 = vmul.f32 %v340_v50, %v296_v53 }
 0x5ed   :  { %v346_v49 = vpop.permute.xlu1 %345 }
 0x5ee   :  { %v348_v51 = vmul.f32 %v346_v49, %v340_v50 }
 0x5f0   :  { %350 = vrot.lane.b32.xlu2 %v348_v51, %s858_s6 }
 0x5f5   :  { %v363_v62 = vpop.permute.xlu1 %362 }
 0x5f6   :  { %vm364_vm11 = vcmp.eq.s32.totalorder %v363_v62, 1 }
 0x5f8   :  { %45 = vperm.xlu2 %788, %v28_v52  }
 0x64a   :  { %v351_v55 = vpop.permute.xlu2 %350 }
 0x64b   :  { %v353_v58 = vadd.f32 %v351_v55, %v343_v54 }
 0x64d   :  { %813 = vtanh.f32 %v353_v58 }
 0x652   :  { %v46_v59 = vpop.permute.xlu2 %45 }
 0x653   :  { %v814_v60 = vpop.eup %813  ;;  %vm62_vm10 = vcmp.eq.s32.totalorder %v46_v59, %v936_v12 }
 0x654   :  { %v750_v61 = vsel %vm62_vm10, 1.0, %v856_v14  ;;  %356 = vrot.lane.b32.xlu0 %v814_v60, %s857_s5  ;;  %vm155_vm10 = vcmp.gt.s32.totalorder %v973_v47, 5 }
 0x655   :  { %758 = vmatmul.msk.f32.gmra.mxu0 %vm83_vm0, %v750_v61 }
 0x6c6   :  { %v357_v63 = vpop.permute.xlu0 %356 }
 0x6c7   :  { %v359_v1 = vmul.f32 %v357_v63, %v340_v50 }
 0x6c9   :  { %v365_v2 = vsel %vm364_vm11, %v359_v1, %v295_v27  ;;  %v366_v27 = vsel %vm364_vm11, %v353_v58, %v296_v53 }
 0x6ca   :  { %368 = vrot.lane.b32.xlu0 %v365_v2, %s858_s6 }
 0x6d2   :  { %v134_v4 = vpop.f32.mrf.mxu0 }
 0x73c   :  { %v369_v3 = vpop.permute.xlu0 %368 }
 0x73d   :  { %768 = vmatmul.msk.f32.vlgmr.msra.gmra.mxu1 %vm158_vm12, %v369_v3 }
 0x7ba   :  { %v389_v5 = vpop.f32.mrf.mxu1 }
 0x7bb   :  { %v392_v6 = vadd.f32 %v389_v5, %v134_v4 }
 0x7bd   :  { %815 = vtanh.f32 %v392_v6  ;;  %v769_v9 = vmul.f32 -1.442695, %v392_v6 }
 0x7bf   :  { %817 = vpow2.f32 %v769_v9 }
 0x7c3   :  { %v816_v7 = vpop.eup %815 }
 0x7c4   :  { %415 = vrot.lane.b32.xlu1 %v816_v7, %s857_s5 }
 0x7c5   :  { %v818_v10 = vpop.eup %817 }
 0x7c6   :  { %v396_v11 = vadd.f32 1.0, %v818_v10 }
 0x7c8   :  { %819 = vrcp.f32 %v396_v11  ;;  %v408_v19 = vand.u32 2147483648, %v396_v11  ;;  %vm402_vm15 = vweird.f32 %v396_v11  ;;  %v406_v20 = vand.u32 2147483647, %v396_v11 }
 0x7ca   :  { %v409_v23 = vor.u32 1.1754944e-38, %v408_v19  ;;  %vm407_vm2 = vcmp.eq.f32.partialorder %v406_v20, 8.507059e+37 }
 0x7cc   :  { %432 = vperm.xlu1 %789, %v430_v8  }
 0x7ce   :  { %v820_v13 = vpop.eup %819 }
 0x7cf   :  { %v398_v15 = vmul.f32 %v820_v13, %v396_v11  ;;  %vm403_vm14 = vweird.f32 %v820_v13  ;;  %v570_v11 = vsel %vm155_vm10, 1, %v855_v0 }
 0x7d0   :  { %vm404_vm1 = vmor %vm402_vm15, %vm403_vm14 }
 0x7d1   :  { %v399_v16 = vsub.f32 1.0, %v398_v15 }
 0x7d3   :  { %v400_v17 = vmul.f32 %v820_v13, %v399_v16 }
 0x7d5   :  { %v401_v18 = vadd.f32 %v820_v13, %v400_v17 }
 0x7d7   :  { %v405_v21 = vsel %vm404_vm1, %v820_v13, %v401_v18 }
 0x7d8   :  { %v410_v25 = vsel %vm407_vm2, %v409_v23, %v405_v21  ;;  %vm156_vm2 = vcmp.gt.s32.totalorder %v973_v47, 6 }
 0x7d9   :  { %v413_v28 = vmul.f32 %v410_v25, %v366_v27 }
 0x836   :  { %v416_v24 = vpop.permute.xlu1 %415 }
 0x837   :  { %v418_v26 = vmul.f32 %v416_v24, %v410_v25 }
 0x839   :  { %420 = vrot.lane.b32.xlu2 %v418_v26, %s858_s6 }
 0x83e   :  { %v433_v33 = vpop.permute.xlu1 %432 }
 0x83f   :  { %vm434_vm3 = vcmp.eq.s32.totalorder %v433_v33, 1 }
 0x893   :  { %v421_v29 = vpop.permute.xlu2 %420 }
 0x894   :  { %v423_v30 = vadd.f32 %v421_v29, %v413_v28 }
 0x896   :  { %821 = vtanh.f32 %v423_v30  ;;  %v436_v61 = vsel %vm434_vm3, %v423_v30, %v366_v27 }
 0x89c   :  { %v822_v31 = vpop.eup %821 }
 0x89d   :  { %426 = vrot.lane.b32.xlu0 %v822_v31, %s857_s5 }
 0x8a5   :  { %48 = vperm.xlu0 %787, %v29_v32  }
 0x90f   :  { %v427_v34 = vpop.permute.xlu0 %426 }
 0x910   :  { %v429_v35 = vmul.f32 %v427_v34, %v410_v25 }
 0x912   :  { %v435_v36 = vsel %vm434_vm3, %v429_v35, %v365_v2 }
 0x913   :  { %438 = vrot.lane.b32.xlu2 %v435_v36, %s858_s6 }
 0x917   :  { %v49_v37 = vpop.permute.xlu0 %48 }
 0x918   :  { %vm63_vm4 = vcmp.eq.s32.totalorder %v49_v37, %v936_v12 }
 0x919   :  { %v751_v38 = vsel %vm63_vm4, 1.0, %v856_v14 }
 0x91a   :  { %759 = vmatmul.msk.f32.gmra.mxu0 %vm83_vm0, %v751_v38 }
 0x96d   :  { %v439_v39 = vpop.permute.xlu2 %438 }
 0x96e   :  { %770 = vmatmul.msk.f32.vlgmr.msra.gmra.mxu2 %vm158_vm12, %v439_v39 }
 0x997   :  { %v137_v40 = vpop.f32.mrf.mxu0 }
 0x9f1   :  { %v459_v41 = vpop.f32.mrf.mxu2 }
 0x9f2   :  { %v462_v42 = vadd.f32 %v459_v41, %v137_v40 }
 0x9f4   :  { %823 = vtanh.f32 %v462_v42  ;;  %v771_v12 = vmul.f32 -1.442695, %v462_v42  ;;  %v640_v42 = vsel %vm156_vm2, 1, %v855_v0 }
 0x9f6   :  { %825 = vpow2.f32 %v771_v12 }
 0x9fa   :  { %v824_v43 = vpop.eup %823 }
 0x9fb   :  { %485 = vrot.lane.b32.xlu1 %v824_v43, %s857_s5 }
 0x9fc   :  { %v826_v14 = vpop.eup %825 }
 0x9fd   :  { %v466_v45 = vadd.f32 1.0, %v826_v14 }
 0x9ff   :  { %827 = vrcp.f32 %v466_v45  ;;  %v478_v52 = vand.u32 2147483648, %v466_v45  ;;  %vm472_vm6 = vweird.f32 %v466_v45  ;;  %v476_v53 = vand.u32 2147483647, %v466_v45 }
 0xa01   :  { %v479_v55 = vor.u32 1.1754944e-38, %v478_v52  ;;  %vm477_vm8 = vcmp.eq.f32.partialorder %v476_v53, 8.507059e+37 }
 0xa03   :  { %502 = vperm.xlu1 %789, %v500_v44  }
 0xa05   :  { %v828_v46 = vpop.eup %827 }
 0xa06   :  { %v468_v48 = vmul.f32 %v828_v46, %v466_v45  ;;  %vm473_vm0 = vweird.f32 %v828_v46 }
 0xa07   :  { %vm474_vm7 = vmor %vm472_vm6, %vm473_vm0 }
 0xa08   :  { %v469_v49 = vsub.f32 1.0, %v468_v48 }
 0xa0a   :  { %v470_v50 = vmul.f32 %v828_v46, %v469_v49 }
 0xa0c   :  { %v471_v51 = vadd.f32 %v828_v46, %v470_v50 }
 0xa0e   :  { %v475_v54 = vsel %vm474_vm7, %v828_v46, %v471_v51  ;;  %vm157_vm7 = vcmp.gt.s32.totalorder %v973_v47, 7 }
 0xa0f   :  { %v480_v59 = vsel %vm477_vm8, %v479_v55, %v475_v54 }
 0xa10   :  { %v483_v62 = vmul.f32 %v480_v59, %v436_v61 }
 0xa6d   :  { %v486_v58 = vpop.permute.xlu1 %485 }
 0xa6e   :  { %v488_v60 = vmul.f32 %v486_v58, %v480_v59 }
 0xa70   :  { %490 = vrot.lane.b32.xlu2 %v488_v60, %s858_s6 }
 0xa75   :  { %v503_v3 = vpop.permute.xlu1 %502 }
 0xa76   :  { %vm504_vm9 = vcmp.eq.s32.totalorder %v503_v3, 1 }
 0xaca   :  { %v491_v63 = vpop.permute.xlu2 %490 }
 0xacb   :  { %v493_v1 = vadd.f32 %v491_v63, %v483_v62 }
 0xacd   :  { %829 = vtanh.f32 %v493_v1  ;;  %v506_v29 = vsel %vm504_vm9, %v493_v1, %v436_v61 }
 0xad3   :  { %v830_v2 = vpop.eup %829 }
 0xad4   :  { %496 = vrot.lane.b32.xlu0 %v830_v2, %s857_s5 }
 0xb46   :  { %v497_v4 = vpop.permute.xlu0 %496 }
 0xb47   :  { %v499_v5 = vmul.f32 %v497_v4, %v480_v59 }
 0xb49   :  { %v505_v6 = vsel %vm504_vm9, %v499_v5, %v435_v36 }
 0xb4a   :  { %508 = vrot.lane.b32.xlu2 %v505_v6, %s858_s6 }
 0xba4   :  { %v509_v7 = vpop.permute.xlu2 %508 }
 0xba5   :  { %772 = vmatmul.msk.f32.vlgmr.msrb.gmra.mxu3 %vm158_vm12, %v509_v7 }
 0xc28   :  { %v529_v8 = vpop.f32.mrf.mxu3 }
 0xc29   :  { %v532_v9 = vadd.f32 %v529_v8, %v963_v22  ;;  %v710_v8 = vsel %vm157_vm7, 1, %v855_v0 }
 0xc2b   :  { %831 = vtanh.f32 %v532_v9  ;;  %v773_v13 = vmul.f32 -1.442695, %v532_v9 }
 0xc2d   :  { %833 = vpow2.f32 %v773_v13 }
 0xc31   :  { %v832_v10 = vpop.eup %831 }
 0xc32   :  { %555 = vrot.lane.b32.xlu0 %v832_v10, %s857_s5 }
 0xc33   :  { %v834_v15 = vpop.eup %833 }
 0xc34   :  { %v536_v16 = vadd.f32 1.0, %v834_v15 }
 0xc36   :  { %835 = vrcp.f32 %v536_v16  ;;  %v548_v22 = vand.u32 2147483648, %v536_v16  ;;  %vm542_vm13 = vweird.f32 %v536_v16  ;;  %v546_v23 = vand.u32 2147483647, %v536_v16 }
 0xc38   :  { %v549_v25 = vor.u32 1.1754944e-38, %v548_v22  ;;  %vm547_vm15 = vcmp.eq.f32.partialorder %v546_v23, 8.507059e+37 }
 0xc3a   :  { %572 = vperm.xlu0 %787, %v570_v11  }
 0xc3c   :  { %v836_v17 = vpop.eup %835 }
 0xc3d   :  { %v538_v18 = vmul.f32 %v836_v17, %v536_v16  ;;  %vm543_vm11 = vweird.f32 %v836_v17 }
 0xc3e   :  { %vm544_vm14 = vmor %vm542_vm13, %vm543_vm11 }
 0xc3f   :  { %v539_v19 = vsub.f32 1.0, %v538_v18 }
 0xc41   :  { %v540_v20 = vmul.f32 %v836_v17, %v539_v19 }
 0xc43   :  { %v541_v21 = vadd.f32 %v836_v17, %v540_v20 }
 0xc45   :  { %v545_v24 = vsel %vm544_vm14, %v836_v17, %v541_v21 }
 0xc46   :  { %v550_v27 = vsel %vm547_vm15, %v549_v25, %v545_v24 }
 0xc47   :  { %v553_v30 = vmul.f32 %v550_v27, %v506_v29 }
 0xca4   :  { %v556_v26 = vpop.permute.xlu0 %555 }
 0xca5   :  { %v558_v28 = vmul.f32 %v556_v26, %v550_v27 }
 0xca7   :  { %560 = vrot.lane.b32.xlu1 %v558_v28, %s858_s6  ;;  %v23_v28 = vld [vmem:[%s1094_s2 + $0x48] sm:$0xff] }
 0xca8   :  { %734 = vmatpush.msra.mxu3 %v23_v28 }
 0xcac   :  { %v573_v34 = vpop.permute.xlu0 %572 }
 0xcad   :  { %vm574_vm1 = vcmp.eq.s32.totalorder %v573_v34, 1 }
 0xd19   :  { %v561_v31 = vpop.permute.xlu1 %560 }
 0xd1a   :  { %v563_v32 = vadd.f32 %v561_v31, %v553_v30  ;;  %v21_v30 = vld [vmem:[%s1094_s2 + $0x38] sm:$0xff]  ;;  %v20_v31 = vld [vmem:[%s1094_s2 + $0x30] sm:$0xff] }
 0xd1c   :  { %837 = vtanh.f32 %v563_v32  ;;  %v576_v58 = vsel %vm574_vm1, %v563_v32, %v506_v29  ;;  %v22_v29 = vld [vmem:[%s1094_s2 + $0x40] sm:$0xff] }
 0xd1d   :  { %735 = vmatpush.msra.mxu3 %v22_v29 }
 0xd1f   :  { %736 = vmatpush.msra.mxu3 %v21_v30 }
 0xd21   :  { %737 = vmatpush.msra.mxu3 %v20_v31 }
 0xd22   :  { %v838_v33 = vpop.eup %837 }
 0xd23   :  { %566 = vrot.lane.b32.xlu2 %v838_v33, %s857_s5 }
 0xd7d   :  { %v567_v35 = vpop.permute.xlu2 %566 }
 0xd7e   :  { %v569_v36 = vmul.f32 %v567_v35, %v550_v27 }
 0xd80   :  { %v575_v37 = vsel %vm574_vm1, %v569_v36, %v505_v6 }
 0xd81   :  { %578 = vrot.lane.b32.xlu1 %v575_v37, %s858_s6 }
 0xdf3   :  { %v579_v38 = vpop.permute.xlu1 %578 }
 0xdf4   :  { %774 = vmatmul.msk.f32.vlgmr.msrb.gmra.mxu1 %vm158_vm12, %v579_v38 }
 0xe71   :  { %v599_v39 = vpop.f32.mrf.mxu1 }
 0xe72   :  { %v602_v40 = vadd.f32 %v599_v39, %v988_v56 }
 0xe74   :  { %839 = vtanh.f32 %v602_v40  ;;  %v775_v43 = vmul.f32 -1.442695, %v602_v40 }
 0xe76   :  { %841 = vpow2.f32 %v775_v43 }
 0xe7a   :  { %v840_v41 = vpop.eup %839 }
 0xe7b   :  { %625 = vrot.lane.b32.xlu2 %v840_v41, %s857_s5 }
 0xe7c   :  { %v842_v44 = vpop.eup %841 }
 0xe7d   :  { %v606_v12 = vadd.f32 1.0, %v842_v44 }
 0xe7f   :  { %843 = vrcp.f32 %v606_v12  ;;  %v618_v56 = vand.u32 2147483648, %v606_v12  ;;  %vm612_vm4 = vweird.f32 %v606_v12  ;;  %v616_v50 = vand.u32 2147483647, %v606_v12 }
 0xe81   :  { %v619_v52 = vor.u32 1.1754944e-38, %v618_v56  ;;  %vm617_vm0 = vcmp.eq.f32.partialorder %v616_v50, 8.507059e+37 }
 0xe83   :  { %642 = vperm.xlu2 %788, %v640_v42  }
 0xe85   :  { %v844_v14 = vpop.eup %843 }
 0xe86   :  { %v608_v45 = vmul.f32 %v844_v14, %v606_v12  ;;  %vm613_vm3 = vweird.f32 %v844_v14 }
 0xe87   :  { %vm614_vm5 = vmor %vm612_vm4, %vm613_vm3 }
 0xe88   :  { %v609_v46 = vsub.f32 1.0, %v608_v45 }
 0xe8a   :  { %v610_v48 = vmul.f32 %v844_v14, %v609_v46 }
 0xe8c   :  { %v611_v49 = vadd.f32 %v844_v14, %v610_v48 }
 0xe8e   :  { %v615_v51 = vsel %vm614_vm5, %v844_v14, %v611_v49 }
 0xe8f   :  { %v620_v54 = vsel %vm617_vm0, %v619_v52, %v615_v51 }
 0xe90   :  { %v623_v59 = vmul.f32 %v620_v54, %v576_v58 }
 0xed5   :  { %v626_v53 = vpop.permute.xlu2 %625 }
 0xed6   :  { %v628_v55 = vmul.f32 %v626_v53, %v620_v54 }
 0xed8   :  { %630 = vrot.lane.b32.xlu0 %v628_v55, %s858_s6 }
 0xedd   :  { %v643_v63 = vpop.permute.xlu2 %642 }
 0xede   :  { %vm644_vm6 = vcmp.eq.s32.totalorder %v643_v63, 1 }
 0xf4a   :  { %v631_v60 = vpop.permute.xlu0 %630 }
 0xf4b   :  { %v633_v61 = vadd.f32 %v631_v60, %v623_v59 }
 0xf4d   :  { %845 = vtanh.f32 %v633_v61  ;;  %v646_v23 = vsel %vm644_vm6, %v633_v61, %v576_v58 }
 0xf53   :  { %v846_v62 = vpop.eup %845 }
 0xf54   :  { %636 = vrot.lane.b32.xlu1 %v846_v62, %s857_s5 }
 0xfc6   :  { %v637_v1 = vpop.permute.xlu1 %636 }
 0xfc7   :  { %v639_v2 = vmul.f32 %v637_v1, %v620_v54 }
 0xfc9   :  { %v645_v3 = vsel %vm644_vm6, %v639_v2, %v575_v37  ;;  %v790_v37 = vld [vmem:[%s1094_s2 + $0x50] ss:$0 sm:$0xff] }
 0xfca   :  { %648 = vrot.lane.b32.xlu0 %v645_v3, %s858_s6 }
0x103c   :  { %v649_v4 = vpop.permute.xlu0 %648 }
0x103d   :  { %776 = vmatmul.msk.f32.vlgmr.msrb.gmra.mxu2 %vm158_vm12, %v649_v4 }
0x10c0   :  { %v669_v5 = vpop.f32.mrf.mxu2 }
0x10c1   :  { %v672_v6 = vadd.f32 %v669_v5, %v990_v57 }
0x10c3   :  { %847 = vtanh.f32 %v672_v6  ;;  %v777_v9 = vmul.f32 -1.442695, %v672_v6 }
0x10c5   :  { %849 = vpow2.f32 %v777_v9 }
0x10c9   :  { %v848_v7 = vpop.eup %847 }
0x10ca   :  { %695 = vrot.lane.b32.xlu1 %v848_v7, %s857_s5 }
0x10cb   :  { %v850_v10 = vpop.eup %849 }
0x10cc   :  { %v676_v11 = vadd.f32 1.0, %v850_v10 }
0x10ce   :  { %851 = vrcp.f32 %v676_v11  ;;  %v688_v57 = vand.u32 2147483648, %v676_v11  ;;  %vm682_vm9 = vweird.f32 %v676_v11  ;;  %v686_v19 = vand.u32 2147483647, %v676_v11 }
0x10d0   :  { %v689_v47 = vor.u32 1.1754944e-38, %v688_v57  ;;  %vm687_vm11 = vcmp.eq.f32.partialorder %v686_v19, 8.507059e+37 }
0x10d2   :  { %712 = vperm.xlu1 %789, %v710_v8  }
0x10d4   :  { %v852_v13 = vpop.eup %851 }
0x10d5   :  { %v678_v15 = vmul.f32 %v852_v13, %v676_v11  ;;  %vm683_vm8 = vweird.f32 %v852_v13 }
0x10d6   :  { %vm684_vm10 = vmor %vm682_vm9, %vm683_vm8 }
0x10d7   :  { %v679_v16 = vsub.f32 1.0, %v678_v15 }
0x10d9   :  { %v680_v17 = vmul.f32 %v852_v13, %v679_v16 }
0x10db   :  { %v681_v18 = vadd.f32 %v852_v13, %v680_v17 }
0x10dd   :  { %v685_v20 = vsel %vm684_vm10, %v852_v13, %v681_v18 }
0x10de   :  { %v690_v21 = vsel %vm687_vm11, %v689_v47, %v685_v20 }
0x10df   :  { %v693_v24 = vmul.f32 %v690_v21, %v646_v23 }
0x113c   :  { %v696_v0 = vpop.permute.xlu1 %695 }
0x113d   :  { %v698_v22 = vmul.f32 %v696_v0, %v690_v21 }
0x113f   :  { %700 = vrot.lane.b32.xlu2 %v698_v22, %s858_s6 }
0x1144   :  { %v713_v32 = vpop.permute.xlu1 %712 }
0x1145   :  { %vm714_vm13 = vcmp.eq.s32.totalorder %v713_v32, 1 }
0x1199   :  { %v701_v25 = vpop.permute.xlu2 %700 }
0x119a   :  { %v703_v26 = vadd.f32 %v701_v25, %v693_v24 }
0x119c   :  { %853 = vtanh.f32 %v703_v26 }
0x11a2   :  { %v854_v27 = vpop.eup %853 }
0x11a3   :  { %706 = vrot.lane.b32.xlu0 %v854_v27, %s857_s5 }
0x1215   :  { %v707_v33 = vpop.permute.xlu0 %706 }
0x1216   :  { %v709_v34 = vmul.f32 %v707_v33, %v690_v21 }
0x1218   :  { %v715_v35 = vsel %vm714_vm13, %v709_v34, %v645_v3 }
0x1219   :  { %718 = vrot.lane.b32.xlu2 %v715_v35, %s858_s6 }
0x1273   :  { %v719_v36 = vpop.permute.xlu2 %718 }
0x1274   :  { %778 = vmatmul.msk.f32.vlgmr.msra.gmra.mxu3 %vm158_vm12, %v719_v36 }
0x12f7   :  { %v739_v38 = vpop.f32.mrf.mxu3 }
0x12f8   :  { %v740_v39 = vadd.f32 %v790_v37, %v739_v38 }
0x12fa   :  { %742 = vst [vmem:[%s1096_s3] sm:$0xff] %v740_v39 }

</bundles_post_ra>
